<compile_context>
chip_gen: v7x
topology: tpu7x:2x2x1
jax: 0.10.0
libtpu: 0.0.40
codegen_flags: <defaults>
</compile_context>

<pallas_src>
import functools

import jax
import jax.numpy as jnp
from jax.experimental import pallas as pl
from jax.experimental.pallas import tpu as pltpu


def _softplus(v):
    # Numerically stable softplus using only basic VPU/EUP ops.
    return jnp.maximum(v, 0.0) + jnp.log1p(jnp.exp(-jnp.abs(v)))


def _bitparm_kernel(x_ref, p_ref, o_ref):
    # x_ref/o_ref: (TR, TL). p_ref: (TR, 3) raw per-row params [h, b, a].
    h = p_ref[:, 0:1]
    b = p_ref[:, 1:2]
    a = p_ref[:, 2:3]
    sph = _softplus(h)            # (TR, 1), broadcast along lanes
    ta = jnp.tanh(a)              # (TR, 1)
    y = x_ref[...] * sph + b
    o_ref[...] = y + jnp.tanh(y) * ta


def _bitparm_final_kernel(x_ref, p_ref, o_ref):
    h = p_ref[:, 0:1]
    b = p_ref[:, 1:2]
    o_ref[...] = x_ref[...] * _softplus(h) + b


def _pick_tiles(rows, hw, itemsize, target_bytes=3 << 20):
    """Pick (row_tile, lane_tile).

    Lane tile: multiple of 128, capped at 8192, so block bytes are bounded
    regardless of H*W (raggedness confined to the last lane block).
    Row tile: multiple of 8, sized so one block is ~<= target_bytes; with
    double-buffered in+out that stays inside v5e's 16 MiB scoped-VMEM default
    and well inside v6e/v7x budgets."""
    if hw <= 256:
        tl = hw                                   # full lane extent (always legal)
    else:
        tl = min(8 * 1024, ((hw + 127) // 128) * 128)

    if rows <= 8:
        tr = rows                                 # full row extent (always legal)
    else:
        max_tr = max(8, target_bytes // (tl * itemsize))
        tr = max(8, (min(max_tr, rows) // 8) * 8)
    return tr, tl


@functools.partial(jax.jit, static_argnames=("final",))
def bitparm_forward(x_nchw, h, b, a=None, *, final=False):
    """x_nchw: (N, C, H, W) float32. h, b, a: (1, C, 1, 1) float32."""
    N, C, H, W = x_nchw.shape
    rows = N * C
    hw = H * W

    # Contiguous reshape only — no transpose, no padding.
    x = x_nchw.reshape(rows, hw)

    # Pack raw per-channel params into one (rows, ncols) array; row n*C+c -> channel c.
    h_c = h.reshape(C)
    b_c = b.reshape(C)
    if final:
        p = jnp.stack([h_c, b_c], axis=-1)                       # (C, 2)
    else:
        p = jnp.stack([h_c, b_c, a.reshape(C)], axis=-1)         # (C, 3)
    p_rows = jnp.tile(p, (N, 1)).astype(x.dtype)                 # (rows, ncols)
    ncols = p_rows.shape[1]

    tr, tl = _pick_tiles(rows, hw, x.dtype.itemsize)
    grid = (pl.cdiv(rows, tr), pl.cdiv(hw, tl))                  # ragged edges masked by Pallas

    x_spec = pl.BlockSpec((tr, tl), lambda i, j: (i, j))
    p_spec = pl.BlockSpec((tr, ncols), lambda i, j: (i, 0))
    out_shape = jax.ShapeDtypeStruct((rows, hw), x.dtype)

    cp = pltpu.CompilerParams(dimension_semantics=("parallel", "parallel"))

    n_elems = rows * hw
    if final:
        ce = pl.CostEstimate(flops=2 * n_elems, transcendentals=0,
                             bytes_accessed=8 * n_elems)
        kernel = _bitparm_final_kernel
    else:
        ce = pl.CostEstimate(flops=4 * n_elems, transcendentals=n_elems,
                             bytes_accessed=8 * n_elems)
        kernel = _bitparm_kernel

    y = pl.pallas_call(
        kernel,
        grid=grid,
        in_specs=[x_spec, p_spec],
        out_specs=x_spec,
        out_shape=out_shape,
        compiler_params=cp,
        cost_estimate=ce,
    )(x, p_rows)

    return y.reshape(N, C, H, W)


def _reference(x, h, b, a, final):
    y = x * jax.nn.softplus(h) + b
    if final:
        return y
    return y + jnp.tanh(y) * jnp.tanh(a)


if __name__ == "__main__":
    key = jax.random.PRNGKey(0)
    kx, kh, kb, ka = jax.random.split(key, 4)

    N, C, H, W = 2, 4, 16, 16
    x = jax.random.normal(kx, (N, C, H, W), dtype=jnp.float32)
    # Parameters init ~ N(0, 0.01) as in torch.nn.init.normal_(..., 0, 0.01)
    h = 0.01 * jax.random.normal(kh, (1, C, 1, 1), dtype=jnp.float32)
    b = 0.01 * jax.random.normal(kb, (1, C, 1, 1), dtype=jnp.float32)
    a = 0.01 * jax.random.normal(ka, (1, C, 1, 1), dtype=jnp.float32)

    # final=False path (the common one)
    y = bitparm_forward(x, h, b, a, final=False)
    jax.block_until_ready(y)
    y_ref = _reference(x, h, b, a, final=False)
    assert y.shape == (N, C, H, W)
    assert jnp.allclose(y, y_ref, atol=1e-5, rtol=1e-5)

    # final=True path
    y_fin = bitparm_forward(x, h, b, final=True)
    jax.block_until_ready(y_fin)
    y_fin_ref = _reference(x, h, b, None, final=True)
    assert jnp.allclose(y_fin, y_fin_ref, atol=1e-5, rtol=1e-5)

    # Ragged lane dim (H*W not a multiple of 128) to exercise masked stores.
    x2 = jax.random.normal(kx, (N, C, 12, 12), dtype=jnp.float32)
    y2 = bitparm_forward(x2, h, b, a, final=False)
    jax.block_until_ready(y2)
    y2_ref = _reference(x2, h, b, a, final=False)
    assert jnp.allclose(y2, y2_ref, atol=1e-5, rtol=1e-5)

    print("KERNEL_OK")
</pallas_src>

<mosaic_0001>
module attributes {stable_mosaic.version = 11 : i64} {
  func.func @_bitparm_kernel(%arg0: i32, %arg1: i32, %arg2: memref<8x256xf32, #tpu.memory_space<vmem>>, %arg3: memref<8x3xf32, #tpu.memory_space<vmem>>, %arg4: memref<8x256xf32, #tpu.memory_space<vmem>>) attributes {dimension_semantics = [#tpu.dimension_semantics<parallel>, #tpu.dimension_semantics<parallel>], iteration_bounds = array<i64: 1, 1>, scalar_prefetch = 0 : i64, scratch_operands = 0 : i64, tpu.core_type = #tpu.core_type<tc>, window_params = [{transform_indices = @transform_0, window_bounds = array<i64: 8, 256>}, {transform_indices = @transform_1, window_bounds = array<i64: 8, 3>}, {transform_indices = @transform_2, window_bounds = array<i64: 8, 256>}]} {
    %c0 = arith.constant 0 : index
    %c0_0 = arith.constant 0 : index
    %0 = vector.load %arg3[%c0, %c0_0] : memref<8x3xf32, #tpu.memory_space<vmem>>, vector<8x1xf32>
    %c0_1 = arith.constant 0 : index
    %c1 = arith.constant 1 : index
    %1 = vector.load %arg3[%c0_1, %c1] : memref<8x3xf32, #tpu.memory_space<vmem>>, vector<8x1xf32>
    %c0_2 = arith.constant 0 : index
    %c2 = arith.constant 2 : index
    %2 = vector.load %arg3[%c0_2, %c2] : memref<8x3xf32, #tpu.memory_space<vmem>>, vector<8x1xf32>
    %cst = arith.constant 0.000000e+00 : f32
    %3 = vector.broadcast %cst : f32 to vector<8x1xf32>
    %4 = arith.maximumf %0, %3 : vector<8x1xf32>
    %5 = math.absf %0 : vector<8x1xf32>
    %cst_3 = arith.constant 0.000000e+00 : f32
    %6 = vector.broadcast %cst_3 : f32 to vector<8x1xf32>
    %7 = arith.subf %6, %5 : vector<8x1xf32>
    %8 = math.exp %7 : vector<8x1xf32>
    %9 = math.log1p %8 : vector<8x1xf32>
    %10 = arith.addf %4, %9 : vector<8x1xf32>
    %11 = math.tanh %2 : vector<8x1xf32>
    %c0_4 = arith.constant 0 : index
    %c0_5 = arith.constant 0 : index
    %12 = vector.load %arg2[%c0_4, %c0_5] : memref<8x256xf32, #tpu.memory_space<vmem>>, vector<8x256xf32>
    %13 = vector.broadcast %10 : vector<8x1xf32> to vector<8x256xf32>
    %14 = arith.mulf %12, %13 : vector<8x256xf32>
    %15 = vector.broadcast %1 : vector<8x1xf32> to vector<8x256xf32>
    %16 = arith.addf %14, %15 : vector<8x256xf32>
    %17 = math.tanh %16 : vector<8x256xf32>
    %18 = vector.broadcast %11 : vector<8x1xf32> to vector<8x256xf32>
    %19 = arith.mulf %17, %18 : vector<8x256xf32>
    %20 = arith.addf %16, %19 : vector<8x256xf32>
    %c0_6 = arith.constant 0 : index
    %c0_7 = arith.constant 0 : index
    %21 = vector.load %arg4[%c0_6, %c0_7] : memref<8x256xf32, #tpu.memory_space<vmem>>, vector<8x256xf32>
    tpu.vector_store %arg4[%c0_6, %c0_7], %20 {strides = array<i32>} : memref<8x256xf32, #tpu.memory_space<vmem>>, vector<8x256xf32>,
    return
  }
  func.func @transform_0(%arg0: i32, %arg1: i32) -> (i32, i32) {
    %c0_i32 = arith.constant 0 : i32
    return %arg0, %arg1 : i32, i32
  }
  func.func @transform_1(%arg0: i32, %arg1: i32) -> (i32, i32) {
    %c0_i32 = arith.constant 0 : i32
    %c0_i32_0 = arith.constant 0 : i32
    return %arg0, %c0_i32 : i32, i32
  }
  func.func @transform_2(%arg0: i32, %arg1: i32) -> (i32, i32) {
    %c0_i32 = arith.constant 0 : i32
    return %arg0, %arg1 : i32, i32
  }
}

</mosaic_0001>

<bundles_post_ra>
// kernel: bitparm_forward.1
= control target key start
LH: loop header
LB: loop body
LE: loop exit
PB: predicated region body
PF: predicated region fallthrough
CT: control target
= control target key end

     0   :  { %v78_v0 = vmov 0   ;;  %v79_v2 = vmov 2   ;;  %v80_v18 = vmov 1   ;;  %s111_s1 = inlined_call_operand.vmem [shape: f32[8,3], index: 1, kind: input, shape index: {}]   ;;  %s112_s0 = inlined_call_operand.vmem [shape: f32[8,256], index: 0, kind: input, shape index: {}]   ;;  %s113_s2 = inlined_call_operand.vmem [shape: f32[8,256], index: 2, kind: output, shape index: {}]  }
   0x1   :  { %64 = vset.pattern.permute.xlu0 %v78_v0  ;;  %v11_v1 = vld [vmem:[%s111_s1] sm:$0xff]  ;;  %66 = vset.pattern.permute.xlu1 %v79_v2  ;;  %v29_v21 = vld [vmem:[%s112_s0 + $0x8] sm:$0xff] }
   0x2   :  { %v13_v3 = vand.u32 2147483647, %v11_v1  ;;  %68 = vtanh.f32 %v11_v1  ;;  %v12_v14 = vmax.f32 %v11_v1, 0.0  ;;  %v28_v20 = vld [vmem:[%s112_s0] sm:$0xff] }
   0x4   :  { %v14_v4 = vsub.f32 0.0, %v13_v3 }
   0x6   :  { %v15_v5 = vmul.f32 1.442695, %v14_v4 }
   0x8   :  { %70 = vpow2.f32 %v15_v5 }
   0xc   :  { %v69_v6 = vpop.eup %68 }
   0xd   :  { %48 = vperm.xlu1 %66, %v69_v6  }
  0x12   :  { %v71_v7 = vpop.eup %70 }
  0x13   :  { %v17_v8 = vadd.f32 1.0, %v71_v7  ;;  %v20_v9 = vmul.f32 -0.5, %v71_v7  ;;  %v23_v11 = vand.u32 2147483647, %v71_v7 }
  0x15   :  { %72 = vlog2.f32 %v17_v8  ;;  %v21_v10 = vadd.f32 1.0, %v20_v9  ;;  %vm24_vm0 = vcmp.lt.f32.partialorder %v23_v11, 0.0004427343 }
  0x17   :  { %v22_v12 = vmul.f32 %v71_v7, %v21_v10 }
  0x1f   :  { %v73_v13 = vpop.eup %72 }
  0x20   :  { %v19_v15 = vmul.f32 0.6931472, %v73_v13 }
  0x22   :  { %v25_v16 = vsel %vm24_vm0, %v22_v12, %v19_v15 }
  0x23   :  { %v26_v17 = vadd.f32 %v25_v16, %v12_v14 }
  0x25   :  { %32 = vperm.xlu0 %64, %v26_v17  }
  0x29   :  { %65 = vset.pattern.permute.xlu0 %v80_v18 }
  0x2a   :  { %39 = vperm.xlu0 %65, %v11_v1  }
  0x2e   :  { %67 = vset.pattern.permute.xlu0 %v79_v2 }
  0x8c   :  { %v49_v27 = vpop.permute.xlu1 %48 }
  0xa4   :  { %v33_v19 = vpop.permute.xlu0 %32 }
  0xa5   :  { %v35_v22 = vmul.f32 %v33_v19, %v28_v20  ;;  %v36_v23 = vmul.f32 %v33_v19, %v29_v21 }
  0xa9   :  { %v40_v24 = vpop.permute.xlu0 %39 }
  0xaa   :  { %v42_v25 = vadd.f32 %v40_v24, %v35_v22  ;;  %v43_v26 = vadd.f32 %v40_v24, %v36_v23 }
  0xac   :  { %74 = vtanh.f32 %v42_v25 }
  0xad   :  { %76 = vtanh.f32 %v43_v26 }
  0xb6   :  { %v75_v28 = vpop.eup %74 }
  0xb7   :  { %v77_v29 = vpop.eup %76  ;;  %v51_v30 = vmul.f32 %v75_v28, %v49_v27 }
  0xb8   :  { %v52_v31 = vmul.f32 %v77_v29, %v49_v27 }
  0xb9   :  { %v53_v32 = vadd.f32 %v51_v30, %v42_v25 }
  0xba   :  { %v54_v33 = vadd.f32 %v52_v31, %v43_v26 }
  0xbb   :  { %55 = vst [vmem:[%s113_s2] sm:$0xff] %v53_v32 }
  0xbc   :  { %56 = vst [vmem:[%s113_s2 + $0x8] sm:$0xff] %v54_v33 }

</bundles_post_ra>
